<compile_context>
chip_gen: v5e
topology: v5e:2x2
jax: 0.10.0
libtpu: 0.0.40
codegen_flags: <defaults>
</compile_context>

<pallas_src>
import functools

import jax
import jax.numpy as jnp
from jax.experimental import pallas as pl
from jax.experimental.pallas import tpu as pltpu


_LANE = 128


def _cdiv(a, b):
    return (a + b - 1) // b


def _round_up(a, b):
    return _cdiv(a, b) * b


def _physical_vmem_bytes():
    """Per-TensorCore physical VMEM; conservative 64 MiB (v7x) fallback."""
    try:
        info = pltpu.get_tpu_info()
        for name in ("vmem_capacity_bytes", "vmem_size_bytes", "vmem_bytes"):
            v = getattr(info, name, None)
            if v:
                return int(v)
    except Exception:
        pass
    return 64 << 20


# -----------------------------------------------------------------------------
# Fused single-pass kernel: one (B, C, HWp) slab per grid step.
# -----------------------------------------------------------------------------
def _se_fused_kernel(x_ref, w1_ref, w2_ref, o_ref, *, inv_hw):
    # x_ref : (B, C, HWp)  input slab (f32 or bf16); HWp is 128-multiple
    # w1_ref: (Cr, C)      conv1 1x1 weight, PyTorch (out, in) layout
    # w2_ref: (C, Cr)      conv2 1x1 weight, PyTorch (out, in) layout
    # o_ref : (B, C, HWp)  output slab, same dtype as input
    x = x_ref[...]

    # Squeeze: per-element channel means (lane reduction), f32 accumulation.
    # Padded lanes are zero, so divide by the true H*W.
    m = jnp.sum(x, axis=-1, dtype=jnp.float32) * inv_hw              # (B, C)

    # Excitation, batched over B (MXU result is B wide instead of 1).
    h = jax.lax.dot_general(m, w1_ref[...], (((1,), (1,)), ((), ())),
                            preferred_element_type=jnp.float32)      # (B, Cr)
    h = jnp.maximum(h, 0.0)
    s = jax.lax.dot_general(h, w2_ref[...], (((1,), (1,)), ((), ())),
                            preferred_element_type=jnp.float32)      # (B, C)
    s = jax.nn.sigmoid(s)

    # Scale: gate cast once to the input dtype, broadcast over lanes.
    # TODO(synk): on v5e (no bf16 VALU) an f32 multiply path is equivalent.
    o_ref[...] = x * s.astype(x.dtype)[:, :, None]


# -----------------------------------------------------------------------------
# Two-pass HW-tiled fallback for feature maps too large for one VMEM block.
# -----------------------------------------------------------------------------
def _se_gate_kernel(x_ref, w1_ref, w2_ref, g_ref, sum_ref, *, inv_hw):
    # grid = (N, num_hw_tiles); the hw axis is the (arbitrary) reduction axis.
    hwi = pl.program_id(1)

    @pl.when(hwi == 0)
    def _():
        sum_ref[...] = jnp.zeros_like(sum_ref)

    sum_ref[...] += jnp.sum(x_ref[0], axis=-1, keepdims=True,
                            dtype=jnp.float32)                       # (C, 1)

    @pl.when(hwi == pl.num_programs(1) - 1)
    def _():
        m = sum_ref[...] * inv_hw                                     # (C, 1)
        h = jnp.dot(w1_ref[...], m, preferred_element_type=jnp.float32)
        h = jnp.maximum(h, 0.0)
        s = jnp.dot(w2_ref[...], h, preferred_element_type=jnp.float32)
        g_ref[0] = jax.nn.sigmoid(s)                                  # (C, 1)


def _se_scale_kernel(x_ref, g_ref, o_ref):
    x = x_ref[...]                                                    # (1, C, hw)
    o_ref[...] = x * g_ref[...].astype(x.dtype)                       # gate (1, C, 1)


# -----------------------------------------------------------------------------
# Wrapper
# -----------------------------------------------------------------------------
def se_block(x, w1, w2, *, force_hw_tile=None):
    """SEBlock forward.  x: (N, C, H, W) f32/bf16, w1: (C//r, C), w2: (C, C//r)."""
    N, C, H, W = x.shape
    HW = H * W
    Cr = w1.shape[0]
    assert w1.shape == (Cr, C) and w2.shape == (C, Cr)

    itemsize = jnp.dtype(x.dtype).itemsize
    inv_hw = 1.0 / HW

    # Lane-dense stores: pad flattened spatial dim to a multiple of 128.
    HWp = _round_up(HW, _LANE)
    x_flat = x.reshape(N, C, HW)
    if HWp != HW:
        x_flat = jnp.pad(x_flat, ((0, 0), (0, 0), (0, HWp - HW)))

    # Generation-aware VMEM budget (v7x: 64 MiB/TC; v5e/v6e: 128 MiB).
    phys = _physical_vmem_bytes()
    cap = (phys * 3) // 4                        # ~48 MiB v7x, ~96 MiB v5e/v6e
    w_bytes = 2 * Cr * C * jnp.dtype(w1.dtype).itemsize
    headroom = 2 << 20
    # in + out blocks are each double-buffered; cap the slab at 8 MiB (the
    # measured roofline knee) to leave vreg/spill headroom.
    per_buffer = min(max((cap - 2 * w_bytes - headroom) // 4, 1 << 20), 8 << 20)
    elem_bytes = C * HWp * itemsize              # one (C, HWp) image

    if force_hw_tile is None and elem_bytes <= per_buffer:
        # ---- fused single-pass path: pack B batch elements per grid step ----
        B = max(per_buffer // elem_bytes, 1)
        B = min(B, N)
        if N >= 2:
            B = min(B, _cdiv(N, 2))              # keep grid >= 2 (v7x megacore)
        Np = _round_up(N, B)
        if Np != N:
            x_flat = jnp.pad(x_flat, ((0, Np - N), (0, 0), (0, 0)))

        block_bytes = B * elem_bytes
        vmem_limit = int(min(cap, max(4 * block_bytes + 2 * w_bytes + headroom,
                                      32 << 20)))
        out_flat = pl.pallas_call(
            functools.partial(_se_fused_kernel, inv_hw=inv_hw),
            out_shape=jax.ShapeDtypeStruct((Np, C, HWp), x.dtype),
            grid_spec=pltpu.PrefetchScalarGridSpec(
                num_scalar_prefetch=0,
                grid=(Np // B,),
                in_specs=[
                    pl.BlockSpec((B, C, HWp), lambda n: (n, 0, 0)),
                    pl.BlockSpec((Cr, C), lambda n: (0, 0)),
                    pl.BlockSpec((C, Cr), lambda n: (0, 0)),
                ],
                out_specs=pl.BlockSpec((B, C, HWp), lambda n: (n, 0, 0)),
            ),
            compiler_params=pltpu.CompilerParams(
                dimension_semantics=("parallel",),
                vmem_limit_bytes=vmem_limit,
            ),
            cost_estimate=pl.CostEstimate(
                flops=int(2 * N * C * HW + 4 * N * Cr * C),
                transcendentals=int(N * C),
                bytes_accessed=int(2 * N * C * HW * itemsize),
            ),
        )(x_flat, w1, w2)
        out_flat = out_flat[:N, :, :HW]
    else:
        # ---- HW-tiled two-pass path (feature map too large for one block) ----
        if force_hw_tile is not None:
            hw_tile = _round_up(min(force_hw_tile, HWp), _LANE)
        else:
            hw_tile = max((per_buffer // (C * itemsize)) // _LANE * _LANE, _LANE)
        HWt = _round_up(HWp, hw_tile)
        if HWt != HWp:
            x_flat = jnp.pad(x_flat, ((0, 0), (0, 0), (0, HWt - HWp)))
        nhw = HWt // hw_tile
        tile_bytes = C * hw_tile * itemsize
        vmem_limit = int(min(cap, max(4 * tile_bytes + 2 * w_bytes + headroom,
                                      32 << 20)))

        # Pass 1: per-image channel means -> excitation -> gate (N, C, 1).
        gates = pl.pallas_call(
            functools.partial(_se_gate_kernel, inv_hw=inv_hw),
            out_shape=jax.ShapeDtypeStruct((N, C, 1), jnp.float32),
            grid_spec=pltpu.PrefetchScalarGridSpec(
                num_scalar_prefetch=0,
                grid=(N, nhw),
                in_specs=[
                    pl.BlockSpec((1, C, hw_tile), lambda n, h: (n, 0, h)),
                    pl.BlockSpec((Cr, C), lambda n, h: (0, 0)),
                    pl.BlockSpec((C, Cr), lambda n, h: (0, 0)),
                ],
                out_specs=pl.BlockSpec((1, C, 1), lambda n, h: (n, 0, 0)),
                scratch_shapes=[pltpu.VMEM((C, 1), jnp.float32)],
            ),
            compiler_params=pltpu.CompilerParams(
                dimension_semantics=("parallel", "arbitrary"),
                vmem_limit_bytes=vmem_limit,
            ),
            cost_estimate=pl.CostEstimate(
                flops=int(N * C * HW + 4 * N * Cr * C),
                transcendentals=int(N * C),
                bytes_accessed=int(N * C * HW * itemsize),
            ),
        )(x_flat, w1, w2)

        # Pass 2: stream x again and apply the resident per-image gate.
        out_flat = pl.pallas_call(
            _se_scale_kernel,
            out_shape=jax.ShapeDtypeStruct((N, C, HWt), x.dtype),
            grid_spec=pltpu.PrefetchScalarGridSpec(
                num_scalar_prefetch=0,
                grid=(N, nhw),
                in_specs=[
                    pl.BlockSpec((1, C, hw_tile), lambda n, h: (n, 0, h)),
                    pl.BlockSpec((1, C, 1), lambda n, h: (n, 0, 0)),
                ],
                out_specs=pl.BlockSpec((1, C, hw_tile), lambda n, h: (n, 0, h)),
            ),
            compiler_params=pltpu.CompilerParams(
                dimension_semantics=("parallel", "parallel"),
                vmem_limit_bytes=vmem_limit,
            ),
            cost_estimate=pl.CostEstimate(
                flops=int(N * C * HW),
                transcendentals=0,
                bytes_accessed=int(2 * N * C * HW * itemsize),
            ),
        )(x_flat, gates)
        out_flat = out_flat[:, :, :HW]

    return out_flat.reshape(N, C, H, W)


def _reference(x, w1, w2):
    xf = x.astype(jnp.float32)
    m = jnp.mean(xf, axis=(2, 3), keepdims=True)                    # (N, C, 1, 1)
    h = jnp.einsum("nchw,oc->nohw", m, w1)                          # conv1 1x1
    h = jnp.maximum(h, 0.0)
    s = jnp.einsum("nchw,oc->nohw", h, w2)                          # conv2 1x1
    return xf * jax.nn.sigmoid(s)


if __name__ == "__main__":
    # SEBlock(in_channels=32, reduction=8, bias=False)
    N, C, H, W = 2, 32, 16, 16
    Cr = C // 8

    key = jax.random.PRNGKey(0)
    kx, k1, k2, kx2 = jax.random.split(key, 4)
    x = jax.random.normal(kx, (N, C, H, W), dtype=jnp.float32)
    w1 = jax.random.normal(k1, (Cr, C), dtype=jnp.float32) * 0.1
    w2 = jax.random.normal(k2, (C, Cr), dtype=jnp.float32) * 0.1

    ref = _reference(x, w1, w2)

    # 1) fused f32 path (HW already a multiple of 128).
    out = jax.block_until_ready(se_block(x, w1, w2))
    assert out.shape == (N, C, H, W) and out.dtype == x.dtype
    assert jnp.allclose(out, ref, atol=1e-5, rtol=1e-5)

    # 2) fused bf16 I/O path (gate applied in bf16).
    xb = x.astype(jnp.bfloat16)
    outb = jax.block_until_ready(se_block(xb, w1, w2))
    refb = _reference(xb, w1, w2)
    assert outb.dtype == jnp.bfloat16
    assert jnp.allclose(outb.astype(jnp.float32), refb, atol=5e-2, rtol=5e-2)

    # 3) two-pass HW-tiled fallback, forced small tile to exercise the path.
    out2 = jax.block_until_ready(se_block(x, w1, w2, force_hw_tile=128))
    assert jnp.allclose(out2, ref, atol=1e-5, rtol=1e-5)

    # 4) non-128-multiple spatial size + odd batch (lane + batch padding).
    N2, H2, W2 = 3, 7, 7
    x2 = jax.random.normal(kx2, (N2, C, H2, W2), dtype=jnp.float32)
    out3 = jax.block_until_ready(se_block(x2, w1, w2))
    ref3 = _reference(x2, w1, w2)
    assert jnp.allclose(out3, ref3, atol=1e-5, rtol=1e-5)

    print("KERNEL_OK")
</pallas_src>

<mosaic_0001>
module attributes {stable_mosaic.version = 11 : i64} {
  func.func @_se_fused_kernel(%arg0: i32, %arg1: memref<1x32x256xf32, #tpu.memory_space<vmem>>, %arg2: memref<4x32xf32, #tpu.memory_space<vmem>>, %arg3: memref<32x4xf32, #tpu.memory_space<vmem>>, %arg4: memref<1x32x256xf32, #tpu.memory_space<vmem>>) attributes {dimension_semantics = [#tpu.dimension_semantics<parallel>], iteration_bounds = array<i64: 2>, scalar_prefetch = 0 : i64, scratch_operands = 0 : i64, tpu.core_type = #tpu.core_type<tc>, window_params = [{transform_indices = @transform_0, window_bounds = array<i64: 1, 32, 256>}, {pipeline_mode = #tpu.pipeline_mode<synchronous>, transform_indices = @transform_1, window_bounds = array<i64: 4, 32>}, {pipeline_mode = #tpu.pipeline_mode<synchronous>, transform_indices = @transform_2, window_bounds = array<i64: 32, 4>}, {transform_indices = @transform_3, window_bounds = array<i64: 1, 32, 256>}]} {
    %c0 = arith.constant 0 : index
    %c0_0 = arith.constant 0 : index
    %c0_1 = arith.constant 0 : index
    %0 = vector.load %arg1[%c0, %c0_0, %c0_1] : memref<1x32x256xf32, #tpu.memory_space<vmem>>, vector<1x32x256xf32>
    %cst = arith.constant dense<0.000000e+00> : vector<1x32xf32>
    %1 = vector.multi_reduction <add>, %0, %cst [2] : vector<1x32x256xf32> to vector<1x32xf32>
    %cst_2 = arith.constant 3.906250e-03 : f32
    %2 = vector.broadcast %cst_2 : f32 to vector<1x32xf32>
    %3 = arith.mulf %1, %2 : vector<1x32xf32>
    %c0_3 = arith.constant 0 : index
    %c0_4 = arith.constant 0 : index
    %4 = vector.load %arg2[%c0_3, %c0_4] : memref<4x32xf32, #tpu.memory_space<vmem>>, vector<4x32xf32>
    %cst_5 = arith.constant dense<0.000000e+00> : vector<1x4xf32>
    %5 = tpu.matmul %3, %4, %cst_5 {dimension_numbers = #tpu.dot_dimension_numbers<[1], [1], [0], [0], [0, 0, 1, 0], [], []>} : vector<1x32xf32>, vector<4x32xf32>, vector<1x4xf32> -> vector<1x4xf32>
    %cst_6 = arith.constant 0.000000e+00 : f32
    %6 = vector.broadcast %cst_6 : f32 to vector<1x4xf32>
    %7 = arith.maximumf %5, %6 : vector<1x4xf32>
    %c0_7 = arith.constant 0 : index
    %c0_8 = arith.constant 0 : index
    %8 = vector.load %arg3[%c0_7, %c0_8] : memref<32x4xf32, #tpu.memory_space<vmem>>, vector<32x4xf32>
    %cst_9 = arith.constant dense<0.000000e+00> : vector<1x32xf32>
    %9 = tpu.matmul %7, %8, %cst_9 {dimension_numbers = #tpu.dot_dimension_numbers<[1], [1], [0], [0], [0, 0, 1, 0], [], []>} : vector<1x4xf32>, vector<32x4xf32>, vector<1x32xf32> -> vector<1x32xf32>
    %10 = arith.negf %9 : vector<1x32xf32>
    %11 = math.exp %10 : vector<1x32xf32>
    %cst_10 = arith.constant 1.000000e+00 : f32
    %12 = vector.broadcast %cst_10 : f32 to vector<1x32xf32>
    %13 = arith.addf %12, %11 : vector<1x32xf32>
    %14 = arith.divf %12, %13 : vector<1x32xf32>
    %15 = vector.shape_cast %14 : vector<1x32xf32> to vector<1x32x1xf32>
    %16 = vector.broadcast %15 : vector<1x32x1xf32> to vector<1x32x256xf32>
    %17 = arith.mulf %0, %16 : vector<1x32x256xf32>
    %c0_11 = arith.constant 0 : index
    %c0_12 = arith.constant 0 : index
    %c0_13 = arith.constant 0 : index
    %18 = vector.load %arg4[%c0_11, %c0_12, %c0_13] : memref<1x32x256xf32, #tpu.memory_space<vmem>>, vector<1x32x256xf32>
    tpu.vector_store %arg4[%c0_11, %c0_12, %c0_13], %17 {strides = array<i32>} : memref<1x32x256xf32, #tpu.memory_space<vmem>>, vector<1x32x256xf32>,
    return
  }
  func.func @transform_0(%arg0: i32) -> (i32, i32, i32) {
    %c0_i32 = arith.constant 0 : i32
    %c0_i32_0 = arith.constant 0 : i32
    %c0_i32_1 = arith.constant 0 : i32
    return %arg0, %c0_i32, %c0_i32_0 : i32, i32, i32
  }
  func.func @transform_1(%arg0: i32) -> (i32, i32) {
    %c0_i32 = arith.constant 0 : i32
    %c0_i32_0 = arith.constant 0 : i32
    %c0_i32_1 = arith.constant 0 : i32
    return %c0_i32, %c0_i32_0 : i32, i32
  }
  func.func @transform_2(%arg0: i32) -> (i32, i32) {
    %c0_i32 = arith.constant 0 : i32
    %c0_i32_0 = arith.constant 0 : i32
    %c0_i32_1 = arith.constant 0 : i32
    return %c0_i32, %c0_i32_0 : i32, i32
  }
  func.func @transform_3(%arg0: i32) -> (i32, i32, i32) {
    %c0_i32 = arith.constant 0 : i32
    %c0_i32_0 = arith.constant 0 : i32
    %c0_i32_1 = arith.constant 0 : i32
    return %arg0, %c0_i32, %c0_i32_0 : i32, i32, i32
  }
}

</mosaic_0001>

<bundles_post_ra>
// kernel: tpu_custom_call.1
= control target key start
LH: loop header
LB: loop body
LE: loop exit
PB: predicated region body
PF: predicated region fallthrough
CT: control target
= control target key end

     0   :  { %8 = vsyncpa [#allocation3], 0  ;;  %s841_s0 = inlined_call_operand.hbm [shape: f32[2,32,256], index: 0, kind: input, shape index: {}]   ;;  %s842_s1 = inlined_call_operand.vmem [shape: f32[4,32], index: 1, kind: input, shape index: {}]   ;;  %s843_s2 = inlined_call_operand.vmem [shape: f32[32,4], index: 2, kind: input, shape index: {}]   ;;  %s844_s3 = inlined_call_operand.hbm [shape: f32[2,32,256], index: 3, kind: output, shape index: {}]  }
   0x1   :  { %10 = vsyncpa [#allocation3 + $0x1], 0 }
   0x2   :  { %11 = vsyncpa [#allocation4], 0 }
   0x3   :  { %13 = vsyncpa [#allocation4 + $0x1], 0  ;;  %s656_s12 = smov 0   ;;  %s658_s13 = smov 0  }
   0x4   :  { %s660_s14 = smov 0   ;;  %s662_s15 = smov 0  }
   0x5 LB: > { %s677_s16 = sadd.s32 4294967295, %s630_s15   ;;  %s451_s17 = sadd.s32 4294967294, %s630_s15   ;;  %s630_s15 = sphi %s662_s15, %s854_s15   ;;  %s626_s14 = sphi %s660_s14, %s853_s14   ;;  %s622_s13 = sphi %s658_s13, %s852_s13   ;;  %s618_s12 = sphi %s656_s12, %s851_s12  }
   0x6   : > { %s681_s18 = sadd.s32 1, %s630_s15   ;;  %s26_s19 = sadd.s32 1, %s626_s14 }
   0x7   : > { %s23_s20 = ssub.s32 %s630_s15, %s681_s18  ;;  %p33_p0 = scmp.ne.s32.totalorder %s626_s14, %s622_s13 }
   0x8   : > { %p24_p1 = scmp.eq.s32.totalorder %s23_s20, 0  ;;  %p34_p2 = scmp.eq.s32.totalorder %s630_s15, 0 }
   0x9   : > { %p39_p3 = scmp.ne.s32.totalorder %s622_s13, %s618_s12  ;;  %p40_p4 = scmp.eq.s32.totalorder %s677_s16, 0 }
   0xa   : > { %s693_s21 = scalar_select %p24_p1, %s626_s14, %s26_s19  }
   0xb   : > { %p695_p5 = por %p34_p2, %p33_p0  ;;  %p699_p6 = por %p40_p4, %p39_p3 }
   0xc   : > { %p105_p7 = scmp.eq.s32.totalorder %s677_s16, 1  ;;  %p111_p8 = scmp.eq.s32.totalorder %s451_s17, 1 }
   0xd   : > { %p487_p10 = scmp.lt.s32.totalorder %s630_s15, 2  ;;  %s137_s26 = sand.u32 1, %s626_s14  }
   0xe   : > { %p706_p11 = por %p105_p7, %p33_p0  ;;  %p710_p12 = por %p111_p8, %p39_p3 }
   0xf   : > { %s473_s27 = sshll.u32 %s630_s15, 6  ;;  %s454_s28 = sshll.u32 %s137_s26, 6 }
  0x10   : > { %s146_s4 = scalar_lea.hbm %s841_s0, %s473_s27  ;;  %s141_s6 = scalar_lea.vmem [#allocation2], %s454_s28 }
  0x11   : > { %s147_s5 = sshll.u32 %s146_s4, 4  ;;  %s149_s7 = sshll.u32 %s141_s6, 4  ;;  %s148_s5 = int_to_ptr.hbm [resolvable:$true] %s147_s5  ;;  %s150_s7 = int_to_ptr.vmem [resolvable:$true] %s149_s7 }
  0x12   : > { %p721_p13 = pnand %p487_p10, %p695_p5  ;;  %p457_p0 = scmp.ge.s32.totalorder %s630_s15, 1 }
  0x13   : > { %p157_p1 = scmp.lt.s32.totalorder %s630_s15, 3  ;;  %s138_s9 = scalar_lea.sflag [#allocation3], %s137_s26 }
  0x14   : > { %s534_s10 = sshra.s32 %s148_s5, 4  ;;  %p538_p3 = pneg %p721_p13  ;;  %s535_s10 = int_to_ptr.hbm [resolvable:$true] %s534_s10 }
  0x15   : > { %s536_s11 = scalar_lea.hbm %s535_s10, 64  ;;  %s541_s20 = scalar_lea.hbm %s841_s0, 128 }
  0x16   : > { %p537_p2 = scmp.ne.s32.totalorder %s535_s10, %s536_s11  ;;  %p542_p5 = scmp.lt.s32.totalorder %s535_s10, %s841_s0 }
  0x17   : > { %p543_p8 = scmp.lt.s32.totalorder %s541_s20, %s536_s11 }
  0x18   : > { %p539_p4 = pnand %p538_p3, %p537_p2 }
  0x19   : > { %p544_p10 = por %p543_p8, %p542_p5 }
  0x1a   : > { %p540_p7 = pneg %p539_p4 }
  0x1c   : > { %p545_p9 = pnand %p544_p10, %p540_p7 }
  0x1e   : > { %548 = shalt.err (!%p545_p9)
}
  0x1f   : > { %s632_s26 = smov 256   ;;  %s633_s28 = smov 16  }
  0x20   : > { %482 = dma.hbm_to_vmem [thread:$0]  (!%p721_p13), %s148_s5, 1024, %s150_s7, %s138_s9, %s632_s26, %s632_s26, %s633_s28  }
  0x21   : > { %p158_p2 = pnand %p457_p0, %p157_p1 }
  0x22   : > { %s742_s29 = sand.u32 (!%p158_p2), 1, %s622_s13  }
  0x23   : > { %161 = sbr.rel (%p158_p2) target bundleno = 583 (0x247), region = 32  ;;  %s458_s30 = sshll.u32 (!%p158_p2), %s742_s29, 6 }
  0x24   : > { %s164_s4 = scalar_lea.sflag (!%p158_p2), [#allocation3], %s742_s29  ;;  %s167_s6 = scalar_lea.vmem (!%p158_p2), [#allocation2], %s458_s30 }
  0x28   : > { %609 = dma.done.wait (%p699_p6), %s164_s4, 1024  }
  0x29   : > { %611 = vsyncadd (%p699_p6), %s164_s4, 4294966272  ;;  %v752_v0 = vld [vmem:[%s167_s6] sm:$0xff]  ;;  %v754_v1 = vld [vmem:[%s167_s6 + $0x8] sm:$0xff]  ;;  %vm235_vm0 = vcmask 261120   ;;  %vm266_vm1 = vcmask 31744   ;;  %v220_v16 = vlaneseq  ;;  %vm225_vm2 = vcmask 130112  }
  0x2a   : > { %v756_v2 = vld [vmem:[%s167_s6 + $0x20] sm:$0xff]  ;;  %v199_v3 = vadd.f32 %v754_v1, %v752_v0  ;;  %v760_v4 = vld [vmem:[%s167_s6 + $0x28] sm:$0xff]  ;;  %v764_v6 = vld [vmem:[%s167_s6 + $0x10] sm:$0xff]  ;;  %vm229_vm3 = vcmask 195712   ;;  %vm233_vm4 = vcmask 261312   ;;  %s190_s22 = scalar_lea.vmem [#allocation5], %s458_s30 }
  0x2b   : > { %v205_v5 = vadd.f32 %v760_v4, %v756_v2  ;;  %v766_v7 = vld [vmem:[%s167_s6 + $0x18] sm:$0xff]  ;;  %v768_v8 = vld [vmem:[%s167_s6 + $0x30] sm:$0xff]  ;;  %v215_v12 = vld [vmem:[%s842_s1] sm:$0xf]  ;;  %v221_v19 = vand.u32 127, %v220_v16  ;;  %v323_v39 = vshrl.u32 %v220_v16, 7 }
  0x2c   : > { %200 = vadd.xlane.f32.xlu0 %v199_v3  ;;  %v770_v9 = vld [vmem:[%s167_s6 + $0x38] sm:$0xff]  ;;  %v202_v10 = vadd.f32 %v766_v7, %v764_v6  ;;  %460 = vmatpush.xpose.msk.msra.mxu0 %vm235_vm0, %v215_v12  ;;  %v264_v14 = vld [vmem:[%s843_s2 + $0x10] sm:$0xff]  ;;  %v263_v15 = vld [vmem:[%s843_s2 + $0x8] sm:$0xff]  ;;  %s474_s27 = sshll.u32 %s677_s16, 6  ;;  %s375_s6 = sshll.u32 %s190_s22, 4  ;;  %s376_s6 = int_to_ptr.vmem [resolvable:$true] %s375_s6 }
  0x2d   : > { %206 = vadd.xlane.f32.xlu1 %v205_v5  ;;  %v208_v11 = vadd.f32 %v770_v9, %v768_v8  ;;  %v265_v13 = vld [vmem:[%s843_s2 + $0x18] sm:$0xff]  ;;  %v223_v21 = vadd.s32 4294967288, %v221_v19  ;;  %v227_v22 = vadd.s32 4294967280, %v221_v19  ;;  %v231_v25 = vadd.s32 4294967272, %v221_v19  ;;  %v262_v36 = vld [vmem:[%s843_s2] sm:$0xff]  ;;  %525 = vset.pattern.permute.xlu2 %v323_v39  ;;  %s374_s4 = scalar_lea.hbm %s844_s3, %s474_s27  ;;  %s363_s16 = scalar_lea.sflag [#allocation4], %s742_s29 }
  0x2e   : > { %462 = vmatpush.xpose.msk.msra.mxu1 %vm266_vm1, %v265_v13  ;;  %v342_v40 = vadd.s32 24, %v323_v39  ;;  %v336_v41 = vadd.s32 16, %v323_v39  ;;  %v330_v57 = vadd.s32 8, %v323_v39  ;;  %s377_s23 = sshll.u32 %s374_s4, 4  ;;  %s584_s9 = scalar_lea.hbm %s844_s3, 128  ;;  %s378_s23 = int_to_ptr.hbm [resolvable:$true] %s377_s23 }
  0x2f   : > { %s578_s30 = sshra.s32 %s378_s23, 4  ;;  %s579_s30 = int_to_ptr.hbm [resolvable:$true] %s578_s30 }
  0x30   : > { %528 = vset.pattern.permute.xlu1 %v342_v40  ;;  %527 = vset.pattern.permute.xlu0 %v336_v41  ;;  %s580_s5 = scalar_lea.hbm %s579_s30, 64  ;;  %p585_p0 = scmp.lt.s32.totalorder %s579_s30, %s844_s3 }
  0x31   : > { %p581_p6 = scmp.ne.s32.totalorder %s579_s30, %s580_s5  ;;  %p586_p1 = scmp.lt.s32.totalorder %s584_s9, %s580_s5 }
  0x32   : > { %463 = vmatpush.xpose.msk.msra.mxu1 %vm266_vm1, %v264_v14 }
  0x33   : > { %p582_p9 = pnand %p581_p6, %p706_p11  ;;  %p587_p3 = por %p586_p1, %p585_p0 }
  0x34   : > { %203 = vadd.xlane.f32.xlu0 %v202_v10 }
  0x35   : > { %209 = vadd.xlane.f32.xlu1 %v208_v11  ;;  %p583_p13 = pneg %p582_p9 }
  0x36   : > { %464 = vmatpush.xpose.msk.msra.mxu1 %vm266_vm1, %v263_v15 }
  0x37   : > { %p588_p4 = pnand %p587_p3, %p583_p13 }
  0x3a   : > { %465 = vmatpush.xpose.msk.msra.mxu1 %vm266_vm1, %v262_v36 }
  0x9f   : > { %v201_v17 = vpop.xlane.xlu0 %200 }
  0xa0   : > { %v207_v18 = vpop.xlane.xlu1 %206  ;;  %v211_v20 = vmul.f32 0.00390625, %v201_v17 }
  0xa1   : > { %v213_v23 = vmul.f32 0.00390625, %v207_v18 }
  0xa2   : > { %v222_v29 = vperm.slane %v211_v20, %v221_v19 }
  0xa3   : > { %v228_v31 = vperm.slane %v213_v23, %v227_v22 }
  0xa7   : > { %v204_v24 = vpop.xlane.xlu0 %203 }
  0xa8   : > { %v212_v26 = vmul.f32 0.00390625, %v204_v24  ;;  %v210_v27 = vpop.xlane.xlu1 %209 }
  0xa9   : > { %v214_v28 = vmul.f32 0.00390625, %v210_v27 }
  0xaa   : > { %v224_v30 = vperm.slane %v212_v26, %v223_v21 }
  0xab   : > { %v232_v32 = vperm.slane %v214_v28, %v231_v25 }
  0xac   : > { %v226_v33 = vsel %vm225_vm2, %v224_v30, %v222_v29 }
  0xad   : > { %v230_v34 = vsel %vm229_vm3, %v228_v31, %v226_v33 }
  0xae   : > { %v234_v35 = vsel %vm233_vm4, %v232_v32, %v230_v34 }
  0xaf   : > { %461 = vmatmul.msk.f32.vlgmr.msra.gmra.mxu0 %vm235_vm0, %v234_v35 }
 0x12c   : > { %v258_v37 = vpop.f32.mrf.mxu0 }
 0x12d   : > { %v261_v38 = vmax.f32 %v258_v37, 0.0 }
 0x12f   : > { %466 = vmatmul.msk.f32.vlgmr.msra.gmra.mxu1 %vm266_vm1, %v261_v38 }
 0x1ac   : > { %v299_v42 = vpop.f32.mrf.mxu1 }
 0x1ad   : > { %v467_v43 = vmul.f32 -1.442695, %v299_v42 }
 0x1af   : > { %530 = vpow2.f32 %v467_v43 }
 0x1b5   : > { %v531_v44 = vpop.eup %530 }
 0x1b6   : > { %v305_v45 = vadd.f32 1.0, %v531_v44 }
 0x1b8   : > { %532 = vrcp.f32 %v305_v45  ;;  %v317_v49 = vand.u32 2147483648, %v305_v45  ;;  %v315_v51 = vand.u32 2147483647, %v305_v45  ;;  %vm311_vm6 = vweird.f32 %v305_v45 }
 0x1ba   : > { %v318_v53 = vor.u32 1.1754944e-38, %v317_v49  ;;  %vm316_vm8 = vcmp.eq.f32.partialorder %v315_v51, 8.507059e+37 }
 0x1be   : > { %v533_v46 = vpop.eup %532 }
 0x1bf   : > { %v307_v47 = vmul.f32 %v533_v46, %v305_v45  ;;  %vm312_vm5 = vweird.f32 %v533_v46 }
 0x1c0   : > { %vm313_vm7 = vmor %vm311_vm6, %vm312_vm5 }
 0x1c1   : > { %v308_v48 = vsub.f32 1.0, %v307_v47 }
 0x1c3   : > { %v309_v50 = vmul.f32 %v533_v46, %v308_v48 }
 0x1c5   : > { %v310_v52 = vadd.f32 %v533_v46, %v309_v50 }
 0x1c7   : > { %v314_v54 = vsel %vm313_vm7, %v533_v46, %v310_v52 }
 0x1c8   : > { %v319_v55 = vsel %vm316_vm8, %v318_v53, %v314_v54 }
 0x1c9   : > { %v321_v56 = vperm.slane %v319_v55, 0 }
 0x1cb   : > { %344 = vperm.xlu1 %528, %v321_v56   ;;  %338 = vperm.xlu0 %527, %v321_v56  }
 0x1cc   : > { %326 = vperm.xlu2 %525, %v321_v56  }
 0x1d3   : > { %529 = vset.pattern.permute.xlu0 %v342_v40 }
 0x1d4   : > { %526 = vset.pattern.permute.xlu2 %v330_v57 }
 0x1dc   : > { %332 = vperm.xlu2 %526, %v321_v56  }
 0x226   : > { %v327_v58 = vpop.permute.xlu2 %326 }
 0x227   : > { %v346_v59 = vmul.f32 %v327_v58, %v752_v0  ;;  %v347_v60 = vmul.f32 %v327_v58, %v754_v1 }
 0x229   : > { %354 = vst [vmem:[%s190_s22] sm:$0xff] %v346_v59 }
 0x22a   : > { %355 = vst [vmem:[%s190_s22 + $0x8] sm:$0xff] %v347_v60 }
 0x236   : > { %v333_v61 = vpop.permute.xlu2 %332 }
 0x237   : > { %v348_v62 = vmul.f32 %v333_v61, %v764_v6  ;;  %v349_v63 = vmul.f32 %v333_v61, %v766_v7 }
 0x239   : > { %356 = vst [vmem:[%s190_s22 + $0x10] sm:$0xff] %v348_v62 }
 0x23a   : > { %357 = vst [vmem:[%s190_s22 + $0x18] sm:$0xff] %v349_v63 }
 0x23d   : > { %v345_v0 = vpop.permute.xlu1 %344  ;;  %v339_v1 = vpop.permute.xlu0 %338 }
 0x23e   : > { %v352_v3 = vmul.f32 %v345_v0, %v768_v8  ;;  %v353_v5 = vmul.f32 %v345_v0, %v770_v9  ;;  %v350_v6 = vmul.f32 %v339_v1, %v756_v2  ;;  %v351_v7 = vmul.f32 %v339_v1, %v760_v4 }
 0x240   : > { %360 = vst [vmem:[%s190_s22 + $0x30] sm:$0xff] %v352_v3 }
 0x241   : > { %361 = vst [vmem:[%s190_s22 + $0x38] sm:$0xff] %v353_v5 }
 0x242   : > { %358 = vst [vmem:[%s190_s22 + $0x20] sm:$0xff] %v350_v6 }
 0x243   : > { %359 = vst [vmem:[%s190_s22 + $0x28] sm:$0xff] %v351_v7 }
 0x244   : > { %591 = shalt.err (!%p588_p4)
}
 0x245   : > { %s634_s29 = smov 256   ;;  %s635_s17 = smov 16  }
 0x246   : > { %477 = dma.vmem_to_hbm [thread:$0]  (%p706_p11), %s376_s6, 1024, %s378_s23, %s363_s16, %s634_s29, %s634_s29, %s635_s17  }
 0x247 PF: > { %s392_s19 = sand.u32 1, %s618_s12   ;;  %p850_p7 = scmp.ge.s32.totalorder %s630_s15, 2 }
 0x248   : > { %s393_s20 = scalar_lea.sflag [#allocation4], %s392_s19 }
 0x249   : > { %p484_p5 = pnand %p850_p7, %p710_p12 }
 0x24b   : > { %p485_p8 = pneg %p484_p5 }
 0x24d   : > { %613 = dma.done.wait (%p485_p8), %s393_s20, 1024  }
 0x24e   : > { %615 = vsyncadd (%p485_p8), %s393_s20, 4294966272  ;;  %p16_p10 = scmp.ge.s32.totalorder %s681_s18, 4   ;;  %s851_s12 = smov %s622_s13 }
 0x24f   : > { %s852_s13 = smov %s626_s14  ;;  %s853_s14 = smov %s693_s21 }
 0x250   : > { %s854_s15 = smov %s681_s18  ;;  %18 = sbr.rel (!%p16_p10) target bundleno = 5 (0x5), region = 77 }
 0x255   :  { %399 = vsyncpa [#allocation3], 1 }
 0x256   :  { %401 = vsyncpa [#allocation3 + $0x1], 1 }
 0x257   :  { %402 = vsyncpa [#allocation4], 1 }
 0x258   :  { %404 = vsyncpa [#allocation4 + $0x1], 1 }

</bundles_post_ra>
